<compile_context>
chip_gen: v5e
topology: v5e:2x2
jax: 0.10.0
libtpu: 0.0.40
codegen_flags: <defaults>
</compile_context>

<pallas_src>
import functools

import jax
import jax.numpy as jnp
from jax.experimental import pallas as pl
from jax.experimental.pallas import tpu as pltpu

EPS = 1e-5                    # nn.InstanceNorm2d default eps
_LANE = 128


# --------------------------------------------------------------------------
# Kernels
# --------------------------------------------------------------------------
def adain_kernel(x_ref, p_ref, o_ref, *, inv_hw):
    """Single-pass fused InstanceNorm + AdaIN affine (block holds full H*W)."""
    # x_ref : (tn, tc, HW)   input tile (input dtype)
    # p_ref : (tn, tc, 2)    f32, [..., 0] = 1+gamma, [..., 1] = beta
    # o_ref : (tn, tc, HW)
    x = x_ref[...].astype(jnp.float32)
    p = p_ref[...]

    mean = jnp.sum(x, axis=-1, keepdims=True) * inv_hw
    xc = x - mean
    var = jnp.sum(xc * xc, axis=-1, keepdims=True) * inv_hw   # two-pass variance

    a = p[..., 0:1] * jax.lax.rsqrt(var + EPS)                # (1+gamma)/std
    o_ref[...] = (xc * a + p[..., 1:2]).astype(o_ref.dtype)


def adain_stats_kernel(x_ref, p_ref, ab_ref, sum_ref, ssq_ref, *, inv_hw):
    """Pass 1 of the large-plane path: accumulate stats over spatial tiles."""
    # x_ref  : (tn, tc, ts)   spatial tile
    # p_ref  : (tn, tc, 2)    f32 fused (1+gamma, beta)
    # ab_ref : (tn, tc, 2)    f32 output: folded (a, c) with out = x*a + c
    sidx = pl.program_id(2)

    @pl.when(sidx == 0)
    def _():
        sum_ref[...] = jnp.zeros_like(sum_ref)
        ssq_ref[...] = jnp.zeros_like(ssq_ref)

    x = x_ref[...].astype(jnp.float32)
    sum_ref[...] += jnp.sum(x, axis=-1, keepdims=True)
    ssq_ref[...] += jnp.sum(x * x, axis=-1, keepdims=True)

    @pl.when(sidx == pl.num_programs(2) - 1)
    def _():
        mean = sum_ref[...] * inv_hw
        var = jnp.maximum(ssq_ref[...] * inv_hw - mean * mean, 0.0)
        p = p_ref[...]
        a = p[..., 0:1] * jax.lax.rsqrt(var + EPS)
        c = p[..., 1:2] - mean * a
        ab_ref[:, :, 0:1] = a
        ab_ref[:, :, 1:2] = c


def adain_apply_kernel(x_ref, ab_ref, o_ref):
    """Pass 2 of the large-plane path: one FMA per element."""
    ab = ab_ref[...]
    x = x_ref[...].astype(jnp.float32)
    o_ref[...] = (x * ab[..., 0:1] + ab[..., 1:2]).astype(o_ref.dtype)


# --------------------------------------------------------------------------
# Tiling / VMEM budgeting helpers
# --------------------------------------------------------------------------
def _budgets(itemsize):
    """(max block bytes, scoped-vmem ceiling) for the current TPU generation."""
    try:
        cap = int(getattr(pltpu.get_tpu_info(), "vmem_capacity_bytes", 64 << 20))
    except Exception:  # conservative fallback
        cap = 64 << 20
    if cap >= (96 << 20):          # v5e / v6e class (128 MiB physical VMEM)
        ceiling = 96 << 20
        max_block = 8 << 20
    else:                          # v7x class (64 MiB physical VMEM)
        ceiling = 44 << 20
        max_block = 4 << 20
    # Per-element VMEM footprint: double-buffered in+out blocks (itemsize each)
    # plus ~2 block-sized f32 temps inside the kernel (upcast + centered copy).
    per_elem = 4 * itemsize + 8
    by_vmem = ((ceiling - (4 << 20)) // per_elem) * itemsize
    return min(max_block, by_vmem), ceiling


def _vmem_limit(block_elems, itemsize, ceiling):
    need = block_elems * (4 * itemsize + 8) + (4 << 20)
    return int(min(ceiling, max(32 << 20, need)))


def _pick_batch_tile(n, plane_bytes, budget):
    """Largest divisor of n fitting the budget, while keeping >= 2 grid steps."""
    cap = max(1, n // 2)
    tn = 1
    for cand in range(1, cap + 1):
        if n % cand == 0 and cand * plane_bytes <= budget:
            tn = cand
    return tn


def _largest_proper_divisor(c, step):
    """Largest proper divisor of c that is a multiple of `step` (or None)."""
    best = None
    for cand in range(step, c, step):
        if c % cand == 0:
            best = cand
    return best


def _pick_channel_tile(c, row_bytes, budget, pack):
    """Largest legal channel tile whose (tc, HW) slab fits the budget.

    Returns None if even a pack-sized slab does not fit (=> spatial tiling).
    """
    if c * row_bytes <= budget:
        return c
    best = None
    step = pack if c % pack == 0 else 8
    for cand in range(step, c, step):
        if c % cand == 0 and cand * row_bytes <= budget:
            best = cand
    return best


def _pick_spatial_tile(hwp, bytes_per_spatial, budget):
    """Largest 128-multiple divisor of hwp fitting the budget (>= 128)."""
    best = _LANE
    for cand in range(_LANE, hwp + 1, _LANE):
        if hwp % cand == 0 and cand * bytes_per_spatial <= budget:
            best = cand
    return best


# --------------------------------------------------------------------------
# Wrapper
# --------------------------------------------------------------------------
def adain(x, s, w, b, *, max_block_bytes=None):
    """x: (N, C, H, W) NCHW; s: (N, S); w: (2C, S); b: (2C,)."""
    N, C, H, W = x.shape
    HW = H * W
    itemsize = jnp.dtype(x.dtype).itemsize
    pack = max(8, 32 // itemsize)          # sublane pack: 8 f32, 16 bf16, 32 i8

    # --- style FC hoisted out of the kernel: one XLA matmul for all N ---
    h = jnp.dot(s.astype(jnp.float32), w.astype(jnp.float32).T,
                preferred_element_type=jnp.float32) + b.astype(jnp.float32)
    # Fused per-(n,c) parameters: [..., 0] = 1 + gamma, [..., 1] = beta.
    params = jnp.stack([1.0 + h[:, :C], h[:, C:]], axis=-1)   # (N, C, 2) f32

    x3 = x.reshape(N, C, HW)               # free reshape (trailing-dim merge)

    budget, ceiling = _budgets(itemsize)
    if max_block_bytes is not None:        # test/override hook
        budget = int(max_block_bytes)

    row_bytes = HW * itemsize
    plane_bytes = C * row_bytes

    tn = 1
    if plane_bytes <= budget:
        # Small planes: keep all channels, pack batch images per block but
        # keep >= 2 grid steps so both v7x TensorCores get work.
        tc = C
        tn = _pick_batch_tile(N, plane_bytes, budget)
        if N // tn < 2:                    # N == 1: split channels instead
            alt = (_largest_proper_divisor(C, pack)
                   or _largest_proper_divisor(C, 8))
            if alt is not None:
                tc = alt
    else:
        # Large planes: tile the channel axis (None => needs spatial tiling).
        tc = _pick_channel_tile(C, row_bytes, budget, pack)

    if tc is not None:
        # ---------------- single-pass fused path -------------------------
        # Block covers the full spatial extent (legal even if HW % 128 != 0
        # since block dim == full array dim); no wrapper pad/slice copies.
        block_elems = tn * tc * HW
        vlim = _vmem_limit(block_elems, itemsize, ceiling)
        grid = (N // tn, C // tc)
        kernel = functools.partial(adain_kernel, inv_hw=1.0 / HW)
        out = pl.pallas_call(
            kernel,
            out_shape=jax.ShapeDtypeStruct((N, C, HW), x.dtype),
            grid=grid,
            in_specs=[
                pl.BlockSpec((tn, tc, HW), lambda n, c: (n, c, 0)),
                pl.BlockSpec((tn, tc, 2), lambda n, c: (n, c, 0)),
            ],
            out_specs=pl.BlockSpec((tn, tc, HW), lambda n, c: (n, c, 0)),
            compiler_params=pltpu.CompilerParams(
                dimension_semantics=("parallel", "parallel"),
                vmem_limit_bytes=vlim),
        )(x3, params)
        return out.reshape(N, C, H, W)

    # ---------------- spatial-tiling fallback (very large H*W) -----------
    # Two passes over HBM: (1) accumulate sum / sum-sq per (n, c) over
    # spatial tiles and fold with the style affine, (2) apply one FMA/elem.
    HWp = ((HW + _LANE - 1) // _LANE) * _LANE
    xp = x3 if HWp == HW else jnp.pad(x3, ((0, 0), (0, 0), (0, HWp - HW)))

    if C % pack == 0:
        tc = pack
    elif C % 8 == 0:
        tc = 8
    else:
        tc = C                              # full-dim block is always legal
    ts = _pick_spatial_tile(HWp, tc * itemsize, budget)

    grid3 = (N, C // tc, HWp // ts)
    block_elems = tc * ts
    vlim = _vmem_limit(block_elems, itemsize, ceiling)

    stats = functools.partial(adain_stats_kernel, inv_hw=1.0 / HW)
    ab = pl.pallas_call(
        stats,
        out_shape=jax.ShapeDtypeStruct((N, C, 2), jnp.float32),
        grid=grid3,
        in_specs=[
            pl.BlockSpec((1, tc, ts), lambda n, c, si: (n, c, si)),
            pl.BlockSpec((1, tc, 2), lambda n, c, si: (n, c, 0)),
        ],
        out_specs=pl.BlockSpec((1, tc, 2), lambda n, c, si: (n, c, 0)),
        scratch_shapes=[pltpu.VMEM((1, tc, 1), jnp.float32),
                        pltpu.VMEM((1, tc, 1), jnp.float32)],
        compiler_params=pltpu.CompilerParams(
            dimension_semantics=("parallel", "parallel", "arbitrary"),
            vmem_limit_bytes=vlim),
    )(xp, params)

    out = pl.pallas_call(
        adain_apply_kernel,
        out_shape=jax.ShapeDtypeStruct((N, C, HWp), x.dtype),
        grid=grid3,
        in_specs=[
            pl.BlockSpec((1, tc, ts), lambda n, c, si: (n, c, si)),
            pl.BlockSpec((1, tc, 2), lambda n, c, si: (n, c, 0)),
        ],
        out_specs=pl.BlockSpec((1, tc, ts), lambda n, c, si: (n, c, si)),
        compiler_params=pltpu.CompilerParams(
            dimension_semantics=("parallel", "parallel", "parallel"),
            vmem_limit_bytes=vlim),
    )(xp, ab)

    if HWp != HW:                           # rare: huge plane with HW % 128 != 0
        out = out[:, :, :HW]
    return out.reshape(N, C, H, W)


def adain_ref(x, s, w, b):
    """Pure-JAX reference matching the PyTorch semantics."""
    C = x.shape[1]
    h = s @ w.T + b
    gamma = h[:, :C][:, :, None, None]
    beta = h[:, C:][:, :, None, None]
    mean = x.mean(axis=(2, 3), keepdims=True)
    var = ((x - mean) ** 2).mean(axis=(2, 3), keepdims=True)
    xn = (x - mean) / jnp.sqrt(var + EPS)
    return (1.0 + gamma) * xn + beta


if __name__ == "__main__":
    # Small shapes consistent with the module's forward.
    N, C, H, W = 2, 4, 16, 16      # x: NCHW
    STYLE_DIM = 16                 # s: (N, style_dim)

    key = jax.random.PRNGKey(0)
    kx, ks, kw, kb = jax.random.split(key, 4)

    x = jax.random.normal(kx, (N, C, H, W), dtype=jnp.float32)
    s = jax.random.normal(ks, (N, STYLE_DIM), dtype=jnp.float32)

    bound = 1.0 / (STYLE_DIM ** 0.5)
    w = jax.random.uniform(kw, (2 * C, STYLE_DIM), jnp.float32, -bound, bound)
    b = jax.random.uniform(kb, (2 * C,), jnp.float32, -bound, bound)

    out = jax.block_until_ready(adain(x, s, w, b))
    ref = adain_ref(x, s, w, b)
    assert out.shape == (N, C, H, W)
    assert jnp.allclose(out, ref, atol=1e-4, rtol=1e-4), "mismatch (fused path)"

    # Exercise the large-plane spatial-tiling fallback at small scale by
    # forcing a tiny block budget (stats pass + apply pass).
    N2, C2, H2, W2 = 2, 8, 16, 32
    kx2, ks2 = jax.random.split(kx)
    x2 = jax.random.normal(kx2, (N2, C2, H2, W2), dtype=jnp.float32)
    s2 = jax.random.normal(ks2, (N2, STYLE_DIM), dtype=jnp.float32)
    w2 = jax.random.uniform(kw, (2 * C2, STYLE_DIM), jnp.float32, -bound, bound)
    b2 = jax.random.uniform(kb, (2 * C2,), jnp.float32, -bound, bound)

    out2 = jax.block_until_ready(
        adain(x2, s2, w2, b2, max_block_bytes=8 * 128 * 4))
    ref2 = adain_ref(x2, s2, w2, b2)
    assert jnp.allclose(out2, ref2, atol=1e-4, rtol=1e-4), "mismatch (tiled path)"

    print("KERNEL_OK")
</pallas_src>

<mosaic_0001>
module attributes {stable_mosaic.version = 11 : i64} {
  func.func @adain_kernel(%arg0: i32, %arg1: i32, %arg2: memref<1x4x256xf32, #tpu.memory_space<vmem>>, %arg3: memref<1x4x2xf32, #tpu.memory_space<vmem>>, %arg4: memref<1x4x256xf32, #tpu.memory_space<vmem>>) attributes {dimension_semantics = [#tpu.dimension_semantics<parallel>, #tpu.dimension_semantics<parallel>], iteration_bounds = array<i64: 2, 1>, scalar_prefetch = 0 : i64, scratch_operands = 0 : i64, tpu.core_type = #tpu.core_type<tc>, window_params = [{transform_indices = @transform_0, window_bounds = array<i64: 1, 4, 256>}, {transform_indices = @transform_1, window_bounds = array<i64: 1, 4, 2>}, {transform_indices = @transform_2, window_bounds = array<i64: 1, 4, 256>}]} {
    %c0 = arith.constant 0 : index
    %c0_0 = arith.constant 0 : index
    %c0_1 = arith.constant 0 : index
    %0 = vector.load %arg2[%c0, %c0_0, %c0_1] : memref<1x4x256xf32, #tpu.memory_space<vmem>>, vector<1x4x256xf32>
    %c0_2 = arith.constant 0 : index
    %c0_3 = arith.constant 0 : index
    %c0_4 = arith.constant 0 : index
    %1 = vector.load %arg3[%c0_2, %c0_3, %c0_4] : memref<1x4x2xf32, #tpu.memory_space<vmem>>, vector<1x4x2xf32>
    %cst = arith.constant dense<0.000000e+00> : vector<1x4xf32>
    %2 = vector.multi_reduction <add>, %0, %cst [2] : vector<1x4x256xf32> to vector<1x4xf32>
    %3 = vector.shape_cast %2 : vector<1x4xf32> to vector<1x4x1xf32>
    %cst_5 = arith.constant 3.906250e-03 : f32
    %4 = vector.broadcast %cst_5 : f32 to vector<1x4x1xf32>
    %5 = arith.mulf %3, %4 : vector<1x4x1xf32>
    %6 = vector.broadcast %5 : vector<1x4x1xf32> to vector<1x4x256xf32>
    %7 = arith.subf %0, %6 : vector<1x4x256xf32>
    %8 = arith.mulf %7, %7 : vector<1x4x256xf32>
    %cst_6 = arith.constant dense<0.000000e+00> : vector<1x4xf32>
    %9 = vector.multi_reduction <add>, %8, %cst_6 [2] : vector<1x4x256xf32> to vector<1x4xf32>
    %10 = vector.shape_cast %9 : vector<1x4xf32> to vector<1x4x1xf32>
    %cst_7 = arith.constant 3.906250e-03 : f32
    %11 = vector.broadcast %cst_7 : f32 to vector<1x4x1xf32>
    %12 = arith.mulf %10, %11 : vector<1x4x1xf32>
    %13 = vector.extract_strided_slice %1 {offsets = [0, 0, 0], sizes = [1, 4, 1], strides = [1, 1, 1]} : vector<1x4x2xf32> to vector<1x4x1xf32>
    %cst_8 = arith.constant 9.99999974E-6 : f32
    %14 = vector.broadcast %cst_8 : f32 to vector<1x4x1xf32>
    %15 = arith.addf %12, %14 : vector<1x4x1xf32>
    %16 = math.rsqrt %15 : vector<1x4x1xf32>
    %17 = arith.mulf %13, %16 : vector<1x4x1xf32>
    %18 = vector.broadcast %17 : vector<1x4x1xf32> to vector<1x4x256xf32>
    %19 = arith.mulf %7, %18 : vector<1x4x256xf32>
    %20 = vector.extract_strided_slice %1 {offsets = [0, 0, 1], sizes = [1, 4, 1], strides = [1, 1, 1]} : vector<1x4x2xf32> to vector<1x4x1xf32>
    %21 = vector.broadcast %20 : vector<1x4x1xf32> to vector<1x4x256xf32>
    %22 = arith.addf %19, %21 : vector<1x4x256xf32>
    %c0_9 = arith.constant 0 : index
    %c0_10 = arith.constant 0 : index
    %c0_11 = arith.constant 0 : index
    %23 = vector.load %arg4[%c0_9, %c0_10, %c0_11] : memref<1x4x256xf32, #tpu.memory_space<vmem>>, vector<1x4x256xf32>
    tpu.vector_store %arg4[%c0_9, %c0_10, %c0_11], %22 {strides = array<i32>} : memref<1x4x256xf32, #tpu.memory_space<vmem>>, vector<1x4x256xf32>,
    return
  }
  func.func @transform_0(%arg0: i32, %arg1: i32) -> (i32, i32, i32) {
    %c0_i32 = arith.constant 0 : i32
    %c0_i32_0 = arith.constant 0 : i32
    return %arg0, %arg1, %c0_i32 : i32, i32, i32
  }
  func.func @transform_1(%arg0: i32, %arg1: i32) -> (i32, i32, i32) {
    %c0_i32 = arith.constant 0 : i32
    %c0_i32_0 = arith.constant 0 : i32
    return %arg0, %arg1, %c0_i32 : i32, i32, i32
  }
  func.func @transform_2(%arg0: i32, %arg1: i32) -> (i32, i32, i32) {
    %c0_i32 = arith.constant 0 : i32
    %c0_i32_0 = arith.constant 0 : i32
    return %arg0, %arg1, %c0_i32 : i32, i32, i32
  }
}

</mosaic_0001>

<bundles_post_ra>
// kernel: tpu_custom_call.1
= control target key start
LH: loop header
LB: loop body
LE: loop exit
PB: predicated region body
PF: predicated region fallthrough
CT: control target
= control target key end

     0   :  { %7 = vsyncpa [#allocation3], 0  ;;  %s747_s0 = inlined_call_operand.hbm [shape: f32[2,4,256], index: 0, kind: input, shape index: {}]   ;;  %s748_s1 = inlined_call_operand.vmem [shape: f32[2,4,2], index: 1, kind: input, shape index: {}]   ;;  %s749_s2 = inlined_call_operand.hbm [shape: f32[2,4,256], index: 2, kind: output, shape index: {}]  }
   0x1   :  { %9 = vsyncpa [#allocation3 + $0x1], 0 }
   0x2   :  { %10 = vsyncpa [#allocation4], 0 }
   0x3   :  { %12 = vsyncpa [#allocation4 + $0x1], 0  ;;  %s614_s9 = smov 0   ;;  %s616_s10 = smov 0  }
   0x4   :  { %s618_s11 = smov 0   ;;  %s620_s12 = smov 0  }
   0x5   :  { %s622_s13 = smov 0   ;;  %s624_s14 = smov 0  }
   0x6 LB: > { %s394_s15 = sadd.s32 4294967295, %s594_s14   ;;  %s395_s16 = sadd.s32 4294967294, %s594_s14   ;;  %s594_s14 = sphi %s624_s14, %s18_s14   ;;  %s590_s13 = sphi %s622_s13, %s758_s13   ;;  %s586_s12 = sphi %s620_s12, %s757_s12   ;;  %s582_s11 = sphi %s618_s11, %s756_s11   ;;  %s578_s10 = sphi %s616_s10, %s755_s10   ;;  %s574_s9 = sphi %s614_s9, %s754_s9  }
   0x7   : > { %s30_s17 = sadd.s32 1, %s590_s13  ;;  %s39_s18 = sadd.s32 1, %s582_s11 }
   0x8   : > { %p32_p0 = scmp.ge.s32.totalorder %s30_s17, 2  ;;  %p46_p1 = scmp.ne.s32.totalorder %s582_s11, %s578_s10 }
   0x9   : > { %p47_p2 = scmp.eq.s32.totalorder %s594_s14, 0  ;;  %p52_p3 = scmp.ne.s32.totalorder %s578_s10, %s574_s9 }
   0xa   : > { %s760_s17 = smov (%p32_p0, %s30_s17), 0  ;;  %p53_p5 = scmp.eq.s32.totalorder %s394_s15, 0 }
   0xb   : > { %p655_p4 = por %p47_p2, %p46_p1  ;;  %s34_s20 = ssub.s32 %s590_s13, %s760_s17 }
   0xc   : > { %p106_p6 = scmp.eq.s32.totalorder %s394_s15, 1  ;;  %p37_p7 = scmp.eq.s32.totalorder %s34_s20, 0 }
   0xd   : > { %p661_p8 = por %p53_p5, %p52_p3  ;;  %p112_p10 = scmp.eq.s32.totalorder %s395_s16, 1 }
   0xe   : > { %p665_p9 = por %p106_p6, %p46_p1  ;;  %p397_p12 = scmp.ge.s32.totalorder %s594_s14, 2 }
   0xf   : > { %s670_s23 = scalar_select %p37_p7, %s582_s11, %s39_s18  }
  0x10   : > { %p672_p11 = por %p112_p10, %p52_p3  ;;  %p424_p13 = scmp.lt.s32.totalorder %s594_s14, 2 }
  0x11   : > { %s132_s25 = sand.u32 1, %s582_s11   ;;  %s410_s27 = sshll.u32 %s590_s13, 3 }
  0x12   : > { %s398_s26 = sshll.u32 %s132_s25, 3  ;;  %s143_s30 = scalar_lea.hbm %s747_s0, %s410_s27 }
  0x13   : > { %s136_s3 = scalar_lea.vmem [#allocation2], %s398_s26  ;;  %s145_s5 = sshll.u32 %s143_s30, 4  ;;  %s146_s5 = int_to_ptr.hbm [resolvable:$true] %s145_s5 }
  0x14   : > { %s147_s4 = sshll.u32 %s136_s3, 4  ;;  %p417_p0 = pnand %p424_p13, %p655_p4  ;;  %s148_s4 = int_to_ptr.vmem [resolvable:$true] %s147_s4 }
  0x15   : > { %p401_p1 = scmp.ge.s32.totalorder %s594_s14, 1  ;;  %p162_p2 = scmp.lt.s32.totalorder %s594_s14, 3 }
  0x16   : > { %s133_s6 = scalar_lea.sflag [#allocation3], %s132_s25 }
  0x17   : > { %419 = dma.hbm_to_vmem [thread:$0]  (!%p417_p0), %s146_s5, 128, %s148_s4, %s133_s6  }
  0x18   : > { %p163_p3 = pnand %p401_p1, %p162_p2 }
  0x19   : > { %s688_s7 = sand.u32 (!%p163_p3), 1, %s578_s10  }
  0x1a   : > { %166 = sbr.rel (%p163_p3) target bundleno = 450 (0x1c2), region = 28  ;;  %s402_s8 = sshll.u32 (!%p163_p3), %s688_s7, 3 }
  0x1b   : > { %s169_s15 = scalar_lea.sflag (!%p163_p3), [#allocation3], %s688_s7  ;;  %s172_s16 = scalar_lea.vmem (!%p163_p3), [#allocation2], %s402_s8 }
  0x1f   : > { %565 = dma.done.wait (%p661_p8), %s169_s15, 128  }
  0x20   : > { %567 = vsyncadd (%p661_p8), %s169_s15, 4294967168  ;;  %v208_v0 = vld [vmem:[%s172_s16] sm:$0xff]  ;;  %vm216_vm0 = vcmask 1043456   ;;  %v596_v6 = vmov 839922192   ;;  %v597_v19 = vmov 0  }
  0x21   : > { %211 = vst [vmem:[#allocation1] ss:$2 sm:$0xff] %v208_v0  ;;  %v225_v7 = vunpack.c.l.s4 %v596_v6  ;;  %477 = vset.pattern.permute.xlu1 %v597_v19  ;;  %v598_v20 = vmov 1   ;;  %p201_p4 = scmp.lt.s32.totalorder %s586_s12, 1  ;;  %s411_s26 = sshll.u32 %s586_s12, 3 }
  0x22   : > { %479 = vset.pattern.permute.xlu0 %v598_v20  ;;  %s290_s29 = scalar_lea.hbm %s749_s2, %s411_s26  ;;  %s200_s30 = scalar_lea.vmem [#allocation5], %s402_s8 }
  0x23   : > { %v226_v8 = vunpack.c.0.s8 %v225_v7  ;;  %s202_s18 = scalar_select %p201_p4, %s586_s12, 1 }
  0x24   : > { %s292_s3 = sshll.u32 %s200_s30, 4  ;;  %s294_s4 = sshll.u32 %s290_s29, 4  ;;  %s293_s3 = int_to_ptr.vmem [resolvable:$true] %s292_s3  ;;  %s295_s4 = int_to_ptr.hbm [resolvable:$true] %s294_s4 }
  0x25   : > { %s404_s19 = sshll.u32 %s202_s18, 2  ;;  %s277_s5 = scalar_lea.sflag [#allocation4], %s688_s7 }
  0x26   : > { %s207_s25 = scalar_lea.vmem %s748_s1, %s404_s19  ;;  %s526_s6 = sshra.s32 %s295_s4, 4  ;;  %s527_s6 = int_to_ptr.hbm [resolvable:$true] %s526_s6 }
  0x27   : > { %v209_v29 = vld [vmem:[%s207_s25] sm:$0xf]  ;;  %s528_s12 = scalar_lea.hbm %s527_s6, 8  ;;  %s532_s8 = scalar_lea.hbm %s749_s2, 16 }
  0x28   : > { %v212_v1 = vld.sshfl [vmem:[#allocation1] sm:$0xff pattern:$0x75316420]  ;;  %v213_v2 = vld.sshfl [vmem:[#allocation1 + $0x8] sm:$0xff pattern:$0x75316420]  ;;  %p529_p5 = scmp.ne.s32.totalorder %s527_s6, %s528_s12  ;;  %p533_p8 = scmp.lt.s32.totalorder %s527_s6, %s749_s2 }
  0x29   : > { %v217_v3 = vsel %vm216_vm0, %v212_v1, 0.0  ;;  %v218_v4 = vsel %vm216_vm0, %v213_v2, 0.0  ;;  %p534_p10 = scmp.lt.s32.totalorder %s532_s8, %s528_s12 }
  0x2a   : > { %v219_v5 = vadd.f32 %v218_v4, %v217_v3  ;;  %p530_p6 = pnand %p529_p5, %p665_p9 }
  0x2b   : > { %p535_p13 = por %p534_p10, %p533_p8 }
  0x2c   : > { %220 = vadd.xlane.f32.xlu0 %v219_v5  ;;  %p531_p7 = pneg %p530_p6 }
  0x2e   : > { %p536_p0 = pnand %p535_p13, %p531_p7 }
  0x9f   : > { %v221_v9 = vpop.xlane.xlu0 %220 }
  0xa0   : > { %v222_v10 = vmul.f32 0.00390625, %v221_v9 }
  0xa2   : > { %v227_v11 = vperm.slane %v222_v10, %v226_v8 }
  0xa4   : > { %v229_v12 = vsub.f32 %v208_v0, %v227_v11 }
  0xa6   : > { %v230_v13 = vmul.f32 %v229_v12, %v229_v12 }
  0xa8   : > { %232 = vst [vmem:[#allocation1] ss:$2 sm:$0xff] %v230_v13 }
  0xaf   : > { %v233_v14 = vld.sshfl [vmem:[#allocation1] sm:$0xff pattern:$0x75316420]  ;;  %v234_v15 = vld.sshfl [vmem:[#allocation1 + $0x8] sm:$0xff pattern:$0x75316420] }
  0xb0   : > { %v237_v16 = vsel %vm216_vm0, %v233_v14, 0.0  ;;  %v238_v17 = vsel %vm216_vm0, %v234_v15, 0.0 }
  0xb1   : > { %v239_v18 = vadd.f32 %v238_v17, %v237_v16 }
  0xb3   : > { %240 = vadd.xlane.f32.xlu0 %v239_v18 }
 0x126   : > { %v241_v21 = vpop.xlane.xlu0 %240 }
 0x127   : > { %v242_v22 = vmul.f32 0.00390625, %v241_v21 }
 0x129   : > { %v243_v23 = vadd.f32 1e-05, %v242_v22 }
 0x12b   : > { %480 = vrsqrt.f32 %v243_v23  ;;  %vm250_vm2 = vweird.f32 %v243_v23 }
 0x131   : > { %v481_v24 = vpop.eup %480 }
 0x132   : > { %v245_v25 = vmul.f32 %v481_v24, %v243_v23  ;;  %vm251_vm1 = vweird.f32 %v481_v24 }
 0x133   : > { %vm252_vm3 = vmor %vm250_vm2, %vm251_vm1 }
 0x134   : > { %v246_v26 = vmul.f32 %v481_v24, %v245_v25 }
 0x136   : > { %v247_v27 = vmul.f32 0.5, %v246_v26 }
 0x138   : > { %v248_v28 = vsub.f32 1.5, %v247_v27 }
 0x13a   : > { %v249_v30 = vmul.f32 %v481_v24, %v248_v28 }
 0x13c   : > { %v253_v31 = vsel %vm252_vm3, %v481_v24, %v249_v30 }
 0x13d   : > { %v254_v32 = vmul.f32 %v253_v31, %v209_v29 }
 0x13f   : > { %257 = vperm.xlu1 %477, %v254_v32  }
 0x147   : > { %478 = vset.pattern.permute.xlu1 %v598_v20 }
 0x148   : > { %267 = vperm.xlu1 %478, %v209_v29  }
 0x1b1   : > { %v258_v33 = vpop.permute.xlu1 %257 }
 0x1b2   : > { %v262_v34 = vperm.slane %v258_v33, %v226_v8 }
 0x1b4   : > { %v264_v36 = vmul.f32 %v262_v34, %v229_v12 }
 0x1ba   : > { %v268_v35 = vpop.permute.xlu1 %267 }
 0x1bb   : > { %v272_v37 = vperm.slane %v268_v35, %v226_v8 }
 0x1bd   : > { %v274_v38 = vadd.f32 %v272_v37, %v264_v36 }
 0x1bf   : > { %275 = vst [vmem:[%s200_s30] sm:$0xff] %v274_v38 }
 0x1c0   : > { %539 = shalt.err (!%p536_p0)
}
 0x1c1   : > { %414 = dma.vmem_to_hbm [thread:$0]  (%p665_p9), %s293_s3, 128, %s295_s4, %s277_s5  }
 0x1c2 PF: > { %s306_s7 = sand.u32 1, %s574_s9   ;;  %p421_p1 = pnand %p397_p12, %p672_p11 }
 0x1c3   : > { %s307_s20 = scalar_lea.sflag [#allocation4], %s306_s7 }
 0x1c4   : > { %p422_p2 = pneg %p421_p1 }
 0x1c6   : > { %569 = dma.done.wait (%p422_p2), %s307_s20, 128  }
 0x1c7   : > { %571 = vsyncadd (%p422_p2), %s307_s20, 4294967168  ;;  %s18_s14 = sadd.s32 1, %s594_s14   ;;  %s754_s9 = smov %s578_s10 }
 0x1c8   : > { %p15_p3 = scmp.ge.s32.totalorder %s18_s14, 4   ;;  %s755_s10 = smov %s582_s11 }
 0x1c9   : > { %s756_s11 = smov %s670_s23  ;;  %s757_s12 = smov %s590_s13 }
 0x1ca   : > { %s758_s13 = smov %s760_s17  ;;  %17 = sbr.rel (!%p15_p3) target bundleno = 6 (0x6), region = 76 }
 0x1cf   :  { %313 = vsyncpa [#allocation3], 1 }
 0x1d0   :  { %315 = vsyncpa [#allocation3 + $0x1], 1 }
 0x1d1   :  { %316 = vsyncpa [#allocation4], 1 }
 0x1d2   :  { %318 = vsyncpa [#allocation4 + $0x1], 1 }

</bundles_post_ra>
